<compile_context>
chip_gen: v7x
topology: tpu7x:2x2x1
jax: 0.10.0
libtpu: 0.0.40
codegen_flags: <defaults>
</compile_context>

<pallas_src>
import math
import functools

import jax
import jax.numpy as jnp
from jax.experimental import pallas as pl
from jax.experimental.pallas import tpu as pltpu


def _round_up(x, m):
    return ((x + m - 1) // m) * m


def _shared_kernel(x_ref, w_ref, b_ref, o_ref):
    # x: (B, C), w: (C, P), b: (1, P), o: (B, P)   [P = round_up(S*N, 128)]
    acc = jnp.dot(x_ref[...], w_ref[...], preferred_element_type=jnp.float32)
    o_ref[...] = (acc + b_ref[...].astype(jnp.float32)).astype(o_ref.dtype)


def _multi_kernel(x_ref, w_ref, b_ref, o_ref):
    # x: (B, S, C), w: (S, C, P), b: (1, S, P), o: (B, S, P)  [P = round_up(N,128)]
    S = w_ref.shape[0]
    for s in range(S):  # static unroll; S is small and known at trace time
        acc = jnp.dot(x_ref[:, s, :], w_ref[s],
                      preferred_element_type=jnp.float32)
        o_ref[:, s, :] = (acc + b_ref[:, s, :].astype(jnp.float32)).astype(o_ref.dtype)


@functools.partial(jax.jit, static_argnames=("stage_1_is_shared",))
def classifier_multi_forward(x, weights, biases, *, stage_1_is_shared):
    """Pallas forward for Classifier_Multi with classifier_indices=[].

    Args:
      x: (B, C) if stage_1_is_shared else (B, S, C)   [C == ch_out]
      weights: (S, N, C)  stacked nn.Linear weights (N == n_classes, torch layout)
      biases:  (S, N)
    Returns:
      {'scores': (B, S, N)}  -- matches torch.cat of unsqueezed per-subset scores.
    """
    S, N, C = weights.shape
    B = x.shape[0]
    cparams = pltpu.CompilerParams(dimension_semantics=("parallel",))

    if stage_1_is_shared:
        # Fuse all S classifiers into one matmul: W_flat[c, s*N+n] = W[s, n, c].
        SN = S * N
        P = _round_up(SN, 128)                               # lane-dense output
        w_flat = jnp.transpose(weights, (2, 0, 1)).reshape(C, SN)
        w_flat = jnp.pad(w_flat, ((0, 0), (0, P - SN)))
        b_flat = jnp.pad(biases.reshape(1, SN), ((0, 0), (0, P - SN)))

        out = pl.pallas_call(
            _shared_kernel,
            out_shape=jax.ShapeDtypeStruct((B, P), x.dtype),
            grid_spec=pltpu.PrefetchScalarGridSpec(
                num_scalar_prefetch=0,
                grid=(1,),
                in_specs=[
                    pl.BlockSpec((B, C), lambda i: (0, 0)),
                    pl.BlockSpec((C, P), lambda i: (0, 0)),
                    pl.BlockSpec((1, P), lambda i: (0, 0)),
                ],
                out_specs=pl.BlockSpec((B, P), lambda i: (0, 0)),
            ),
            compiler_params=cparams,
        )(x, w_flat, b_flat)
        scores = out[:, :SN].reshape(B, S, N)
    else:
        # x stays (B, S, C); weights pre-transposed to (S, C, N), N padded to
        # 128 lanes so stores are unmasked and lane-dense.
        P = _round_up(N, 128)
        w_t = jnp.transpose(weights, (0, 2, 1))              # (S, C, N)
        w_t = jnp.pad(w_t, ((0, 0), (0, 0), (0, P - N)))
        b_t = jnp.pad(biases.reshape(1, S, N), ((0, 0), (0, 0), (0, P - N)))

        out = pl.pallas_call(
            _multi_kernel,
            out_shape=jax.ShapeDtypeStruct((B, S, P), x.dtype),
            grid_spec=pltpu.PrefetchScalarGridSpec(
                num_scalar_prefetch=0,
                grid=(1,),
                in_specs=[
                    pl.BlockSpec((B, S, C), lambda i: (0, 0, 0)),
                    pl.BlockSpec((S, C, P), lambda i: (0, 0, 0)),
                    pl.BlockSpec((1, S, P), lambda i: (0, 0, 0)),
                ],
                out_specs=pl.BlockSpec((B, S, P), lambda i: (0, 0, 0)),
            ),
            compiler_params=cparams,
        )(x, w_t, b_t)
        scores = out[:, :, :N]

    return {"scores": scores}


def init_params(key, n_subsets, ch_out, n_classes):
    """Deterministic kaiming_normal_ (fan_in, gain=sqrt(2)) weights, zero bias."""
    std = math.sqrt(2.0 / ch_out)
    w = jax.random.normal(key, (n_subsets, n_classes, ch_out), jnp.float32) * std
    b = jnp.zeros((n_subsets, n_classes), jnp.float32)
    return w, b


if __name__ == "__main__":
    key = jax.random.PRNGKey(0)
    B, S, C, N = 2, 3, 32, 4          # batch, n_subsets, ch_out, n_classes
    k_w, k_x1, k_x2 = jax.random.split(key, 3)

    W, b = init_params(k_w, n_subsets=S, ch_out=C, n_classes=N)

    # stage_1_is_shared=True : every classifier sees the same x of shape (B, C)
    x_shared = jax.random.normal(k_x1, (B, C), jnp.float32)
    out_shared = classifier_multi_forward(x_shared, W, b, stage_1_is_shared=True)
    jax.block_until_ready(out_shared["scores"])

    # stage_1_is_shared=False : classifier i sees x[:, i] ; x is (B, S, C)
    x_multi = jax.random.normal(k_x2, (B, S, C), jnp.float32)
    out_multi = classifier_multi_forward(x_multi, W, b, stage_1_is_shared=False)
    jax.block_until_ready(out_multi["scores"])

    # pure-JAX reference check
    ref_shared = jnp.einsum("bc,snc->bsn", x_shared, W) + b[None, :, :]
    ref_multi = jnp.einsum("bsc,snc->bsn", x_multi, W) + b[None, :, :]
    assert out_shared["scores"].shape == (B, S, N)
    assert out_multi["scores"].shape == (B, S, N)
    assert jnp.allclose(out_shared["scores"], ref_shared, atol=1e-5)
    assert jnp.allclose(out_multi["scores"], ref_multi, atol=1e-5)

    print("KERNEL_OK")
</pallas_src>

<mosaic_0001>
module attributes {stable_mosaic.version = 11 : i64} {
  func.func @_shared_kernel(%arg0: i32, %arg1: memref<2x32xf32, #tpu.memory_space<vmem>>, %arg2: memref<32x128xf32, #tpu.memory_space<vmem>>, %arg3: memref<1x128xf32, #tpu.memory_space<vmem>>, %arg4: memref<2x128xf32, #tpu.memory_space<vmem>>) attributes {dimension_semantics = [#tpu.dimension_semantics<parallel>], iteration_bounds = array<i64: 1>, scalar_prefetch = 0 : i64, scratch_operands = 0 : i64, tpu.core_type = #tpu.core_type<tc>, window_params = [{pipeline_mode = #tpu.pipeline_mode<synchronous>, transform_indices = @transform_0, window_bounds = array<i64: 2, 32>}, {pipeline_mode = #tpu.pipeline_mode<synchronous>, transform_indices = @transform_1, window_bounds = array<i64: 32, 128>}, {pipeline_mode = #tpu.pipeline_mode<synchronous>, transform_indices = @transform_2, window_bounds = array<i64: 1, 128>}, {pipeline_mode = #tpu.pipeline_mode<synchronous>, transform_indices = @transform_3, window_bounds = array<i64: 2, 128>}]} {
    %c0 = arith.constant 0 : index
    %c0_0 = arith.constant 0 : index
    %0 = vector.load %arg1[%c0, %c0_0] : memref<2x32xf32, #tpu.memory_space<vmem>>, vector<2x32xf32>
    %c0_1 = arith.constant 0 : index
    %c0_2 = arith.constant 0 : index
    %1 = vector.load %arg2[%c0_1, %c0_2] : memref<32x128xf32, #tpu.memory_space<vmem>>, vector<32x128xf32>
    %cst = arith.constant dense<0.000000e+00> : vector<2x128xf32>
    %2 = tpu.matmul %0, %1, %cst {dimension_numbers = #tpu.dot_dimension_numbers<[1], [0], [0], [1], [0, 0, 1, 1], [], []>} : vector<2x32xf32>, vector<32x128xf32>, vector<2x128xf32> -> vector<2x128xf32>
    %c0_3 = arith.constant 0 : index
    %c0_4 = arith.constant 0 : index
    %3 = vector.load %arg3[%c0_3, %c0_4] : memref<1x128xf32, #tpu.memory_space<vmem>>, vector<1x128xf32>
    %4 = vector.broadcast %3 : vector<1x128xf32> to vector<2x128xf32>
    %5 = arith.addf %2, %4 : vector<2x128xf32>
    %c0_5 = arith.constant 0 : index
    %c0_6 = arith.constant 0 : index
    %6 = vector.load %arg4[%c0_5, %c0_6] : memref<2x128xf32, #tpu.memory_space<vmem>>, vector<2x128xf32>
    tpu.vector_store %arg4[%c0_5, %c0_6], %5 {strides = array<i32>} : memref<2x128xf32, #tpu.memory_space<vmem>>, vector<2x128xf32>,
    return
  }
  func.func @transform_0(%arg0: i32) -> (i32, i32) {
    %c0_i32 = arith.constant 0 : i32
    %c0_i32_0 = arith.constant 0 : i32
    %c0_i32_1 = arith.constant 0 : i32
    return %c0_i32, %c0_i32_0 : i32, i32
  }
  func.func @transform_1(%arg0: i32) -> (i32, i32) {
    %c0_i32 = arith.constant 0 : i32
    %c0_i32_0 = arith.constant 0 : i32
    %c0_i32_1 = arith.constant 0 : i32
    return %c0_i32, %c0_i32_0 : i32, i32
  }
  func.func @transform_2(%arg0: i32) -> (i32, i32) {
    %c0_i32 = arith.constant 0 : i32
    %c0_i32_0 = arith.constant 0 : i32
    %c0_i32_1 = arith.constant 0 : i32
    return %c0_i32, %c0_i32_0 : i32, i32
  }
  func.func @transform_3(%arg0: i32) -> (i32, i32) {
    %c0_i32 = arith.constant 0 : i32
    %c0_i32_0 = arith.constant 0 : i32
    %c0_i32_1 = arith.constant 0 : i32
    return %c0_i32, %c0_i32_0 : i32, i32
  }
}

</mosaic_0001>

<bundles_post_ra>
// kernel: classifier_multi_forward.1
= control target key start
LH: loop header
LB: loop body
LE: loop exit
PB: predicated region body
PF: predicated region fallthrough
CT: control target
= control target key end

     0   :  { %v132_v0 = vmov 0.0|0.0   ;;  %vm133_vm0 = vmmov 0   ;;  %v134_v4 = vmov 0.0   ;;  %vm26_vm1 = vcmask 261120   ;;  %s176_s1 = inlined_call_operand.vmem [shape: f32[32,128], index: 1, kind: input, shape index: {}]   ;;  %s177_s0 = inlined_call_operand.vmem [shape: f32[2,32], index: 0, kind: input, shape index: {}]   ;;  %s178_s2 = inlined_call_operand.vmem [shape: f32[1,128], index: 2, kind: input, shape index: {}]   ;;  %s179_s3 = inlined_call_operand.vmem [shape: f32[2,128], index: 3, kind: output, shape index: {}]  }
   0x1   :  { %123 = vmatprep.subr.bf16.mxu0 %v132_v0  ;;  %v15_v1 = vld [vmem:[%s176_s1] sm:$0xff]  ;;  %v16_v2 = vld [vmem:[%s176_s1 + $0x8] sm:$0xff]  ;;  %v17_v3 = vld [vmem:[%s176_s1 + $0x10] sm:$0xff]  ;;  %120 = vmatprep.mubr.msk.f32.mxu0 %vm133_vm0, %v134_v4 }
   0x2   :  { %v124_v5 = vpack.c.bf16 %v16_v2, %v15_v1  ;;  %v18_v6 = vld [vmem:[%s176_s1 + $0x18] sm:$0xff]  ;;  %v14_v8 = vld [vmem:[%s177_s0] sm:$0x3] }
   0x3   :  { %v127_v7 = vpack.c.bf16 %v18_v6, %v17_v3  ;;  %v105_v9 = vld [vmem:[%s178_s2] ss:$0 sm:$0xff] }
   0x4   :  { %125 = vmatpush3.bf16.msra.mxu0 %v124_v5 }
   0x5   :  { %126 = vmatprep.subr.bf16.mxu0 %v132_v0 }
   0x8   :  { %128 = vmatpush3.bf16.msra.mxu0 %v127_v7 }
   0xb   :  { %121 = vmatmul.mubr.msk.f32.vlgmr.msra.gmra.mrb[0].mxu0 %vm26_vm1, %v14_v8 }
  0xde   :  { %v96_v10 = vpop.f32.mrb[0].mxu0 }
  0xdf   :  { %v97_v11 = vadd.f32 %v105_v9, %v96_v10  ;;  %v122_v12 = vpop.f32.mrb[1].mxu0 }
  0xe1   :  { %100 = vst [vmem:[%s179_s3] sm:$0x3] %v97_v11 }

</bundles_post_ra>
